<compile_context>
chip_gen: v5e
topology: v5e:2x2
jax: 0.10.0
libtpu: 0.0.40
codegen_flags: <defaults>
</compile_context>

<pallas_src>
import functools

import jax
import jax.numpy as jnp
from jax.experimental import pallas as pl
from jax.experimental.pallas import tpu as pltpu


def _round_up(x, m):
    return ((x + m - 1) // m) * m


def _patch_embed_kernel(a_ref, w_ref, b_ref, o_ref, *, out_bit):
    """Fused patch GEMM (bf16 MXU, f32 acc) + bias + DoReFa activation quant (f32 VPU)."""
    acc = jnp.dot(a_ref[...], w_ref[...], preferred_element_type=jnp.float32)
    acc = acc + b_ref[...]                        # (1, TN) bias broadcast over rows
    if out_bit < 32:
        n = float(2 ** out_bit - 1)
        acc = jnp.clip(acc, 0.0, 1.0)             # activation_quantize_fn: clamp to [0,1]
        # TODO(synk): jnp.round is round-half-to-even; some DoReFa impls use floor(x+0.5).
        acc = jnp.round(acc * n) * (1.0 / n)      # uniform 2^a - 1 levels
    # TODO(synk): if the reference activation_quantize_fn clamps even at a_bit==32,
    # move the clip outside the `if`.
    o_ref[...] = acc.astype(o_ref.dtype)


def _quantize_weight_dorefa(w, w_bit):
    """DoReFa weight quantization (conv2d_Q_fn): tanh-normalize, k-bit uniform quant."""
    if w_bit >= 32:
        return w
    t = jnp.tanh(w)
    # Epsilon so an all-zero weight tensor does not produce 0/0 -> NaN.
    t = t / jnp.maximum(jnp.max(jnp.abs(t)), 1e-12)
    n = float(2 ** w_bit - 1)
    return 2.0 * (jnp.round((t * 0.5 + 0.5) * n) / n) - 1.0


@functools.partial(
    jax.jit, static_argnames=("patch_size", "w_bit", "out_bit", "out_dtype"))
def quantized_patch_embed(x, weight, bias, *, patch_size, w_bit=4, out_bit=4,
                          out_dtype=jnp.bfloat16):
    """Forward of QuantizedPatchEmbed: (B, C, H, W) -> (B, num_patches, embed_dim)."""
    B, C, H, W = x.shape
    P = patch_size
    assert H % P == 0 and W % P == 0, (H, W, P)
    gh, gw = H // P, W // P
    num_patches = gh * gw
    E = weight.shape[0]
    K = C * P * P
    M = B * num_patches

    # ---- im2col glue: one fused bf16 pass under this jit -----------------------
    # Cast to bf16 FIRST so the transpose pass moves half the bytes.  Patch flatten
    # order is (C, kH, kW) to match the PyTorch conv-weight layout.
    xb = x.astype(jnp.bfloat16)
    patches = xb.reshape(B, C, gh, P, gw, P).transpose(0, 2, 4, 1, 3, 5)
    patches = patches.reshape(M, K)                               # (M, K) bf16

    wq = _quantize_weight_dorefa(weight.astype(jnp.float32), w_bit)
    w2 = wq.reshape(E, K).T.astype(jnp.bfloat16)                  # (K, E) bf16
    b2 = bias.astype(jnp.float32).reshape(1, E)                   # (1, E) f32

    # ---- tile sizing ------------------------------------------------------------
    # M: multiples of 16 (bf16 packs 2 rows per sublane).  Aim for >=2 M-programs so
    # the parallel M axis can be sharded over both v7x TensorCores; cap at 1024 rows
    # so the double-buffered A tile stays a few MiB even at K=3072 (patch 32, RGB).
    M16 = _round_up(M, 16)
    TM = min(1024, _round_up(pl.cdiv(M16, 2), 16))
    M_pad = _round_up(M16, TM)
    if M_pad != M:
        patches = jnp.pad(patches, ((0, M_pad - M), (0, 0)))

    # N: never padded.  Lane-dense 256-wide tiles (matches the 256x256 v6e/v7x MXU)
    # when E allows, 128 when only 128-aligned, otherwise one full unpadded E block
    # (block last dim == full array dim is legal: masked vst, but far fewer HBM bytes
    # than padding to 128 + a post-call slice).
    if E % 256 == 0:
        TN = 256
    elif E % 128 == 0:
        TN = 128
    else:
        TN = E

    # M outer, N inner: the A tile index (i, 0) is constant over j, so A is read once.
    grid = (M_pad // TM, E // TN)

    out_itemsize = jnp.dtype(out_dtype).itemsize
    vmem_bytes = 2 * (TM * K * 2 + K * TN * 2 + TN * 4 + TM * TN * out_itemsize)
    vmem_limit = int(min(max(vmem_bytes + (8 << 20), 32 << 20), 48 << 20))

    out = pl.pallas_call(
        functools.partial(_patch_embed_kernel, out_bit=out_bit),
        out_shape=jax.ShapeDtypeStruct((M_pad, E), out_dtype),
        grid_spec=pltpu.PrefetchScalarGridSpec(
            num_scalar_prefetch=0,
            grid=grid,
            in_specs=[
                pl.BlockSpec((TM, K), lambda i, j: (i, 0)),   # patch rows (full K)
                pl.BlockSpec((K, TN), lambda i, j: (0, j)),   # weight column tile
                pl.BlockSpec((1, TN), lambda i, j: (0, j)),   # bias tile (N axis only)
            ],
            out_specs=pl.BlockSpec((TM, TN), lambda i, j: (i, j)),
        ),
        compiler_params=pltpu.CompilerParams(
            dimension_semantics=("parallel", "parallel"),
            vmem_limit_bytes=vmem_limit,
        ),
    )(patches, w2, b2)

    if M_pad != M:
        out = out[:M]
    return out.reshape(B, num_patches, E)


if __name__ == "__main__":
    # Small shapes consistent with the module: img_size=16, patch=4, in_c=4, embed_dim=32.
    B, C, H, W = 2, 4, 16, 16
    P, E = 4, 32

    key = jax.random.PRNGKey(0)
    kx, kw, kb = jax.random.split(key, 3)
    x = jax.random.normal(kx, (B, C, H, W), jnp.float32)
    # Conv2d(in_c=C, embed_dim=E, kernel=P, stride=P): weight (E, C, P, P), bias (E,)
    weight = jax.random.normal(kw, (E, C, P, P), jnp.float32) * 0.1
    bias = jax.random.normal(kb, (E,), jnp.float32) * 0.01

    y = quantized_patch_embed(x, weight, bias, patch_size=P, w_bit=4, out_bit=4)
    y = jax.block_until_ready(y)
    assert y.shape == (B, (H // P) * (W // P), E), y.shape

    # Loose sanity check against a pure-JAX reference built from the same bf16
    # operands; tolerance is > one quant level (1/15) only to absorb rare boundary
    # flips caused by different f32 summation order.
    wq = _quantize_weight_dorefa(weight, 4).astype(jnp.bfloat16)
    pr = (x.astype(jnp.bfloat16)
          .reshape(B, C, H // P, P, W // P, P)
          .transpose(0, 2, 4, 1, 3, 5)
          .reshape(B, (H // P) * (W // P), C * P * P))
    ref = jnp.einsum("bnk,ke->bne", pr, wq.reshape(E, -1).T,
                     preferred_element_type=jnp.float32) + bias
    lvl = float(2 ** 4 - 1)
    ref = jnp.round(jnp.clip(ref, 0.0, 1.0) * lvl) / lvl
    err = float(jnp.max(jnp.abs(y.astype(jnp.float32) - ref)))
    assert err < 0.08, err

    print("KERNEL_OK")
</pallas_src>

<mosaic_0001>
module attributes {stable_mosaic.version = 11 : i64} {
  func.func @_patch_embed_kernel(%arg0: i32, %arg1: i32, %arg2: memref<16x64xbf16, #tpu.memory_space<vmem>>, %arg3: memref<64x32xbf16, #tpu.memory_space<vmem>>, %arg4: memref<1x32xf32, #tpu.memory_space<vmem>>, %arg5: memref<16x32xbf16, #tpu.memory_space<vmem>>) attributes {dimension_semantics = [#tpu.dimension_semantics<parallel>, #tpu.dimension_semantics<parallel>], iteration_bounds = array<i64: 2, 1>, scalar_prefetch = 0 : i64, scratch_operands = 0 : i64, tpu.core_type = #tpu.core_type<tc>, window_params = [{transform_indices = @transform_0, window_bounds = array<i64: 16, 64>}, {transform_indices = @transform_1, window_bounds = array<i64: 64, 32>}, {transform_indices = @transform_2, window_bounds = array<i64: 1, 32>}, {transform_indices = @transform_3, window_bounds = array<i64: 16, 32>}]} {
    %c0 = arith.constant 0 : index
    %c0_0 = arith.constant 0 : index
    %0 = vector.load %arg2[%c0, %c0_0] : memref<16x64xbf16, #tpu.memory_space<vmem>>, vector<16x64xbf16>
    %c0_1 = arith.constant 0 : index
    %c0_2 = arith.constant 0 : index
    %1 = vector.load %arg3[%c0_1, %c0_2] : memref<64x32xbf16, #tpu.memory_space<vmem>>, vector<64x32xbf16>
    %cst = arith.constant dense<0.000000e+00> : vector<16x32xf32>
    %2 = tpu.matmul %0, %1, %cst {dimension_numbers = #tpu.dot_dimension_numbers<[1], [0], [0], [1], [0, 0, 1, 1], [], []>} : vector<16x64xbf16>, vector<64x32xbf16>, vector<16x32xf32> -> vector<16x32xf32>
    %c0_3 = arith.constant 0 : index
    %c0_4 = arith.constant 0 : index
    %3 = vector.load %arg4[%c0_3, %c0_4] : memref<1x32xf32, #tpu.memory_space<vmem>>, vector<1x32xf32>
    %4 = vector.broadcast %3 : vector<1x32xf32> to vector<16x32xf32>
    %5 = arith.addf %2, %4 : vector<16x32xf32>
    %cst_5 = arith.constant 0.000000e+00 : f32
    %cst_6 = arith.constant 1.000000e+00 : f32
    %6 = vector.broadcast %cst_5 : f32 to vector<16x32xf32>
    %7 = arith.maximumf %6, %5 : vector<16x32xf32>
    %8 = vector.broadcast %cst_6 : f32 to vector<16x32xf32>
    %9 = arith.minimumf %8, %7 : vector<16x32xf32>
    %cst_7 = arith.constant 1.500000e+01 : f32
    %10 = vector.broadcast %cst_7 : f32 to vector<16x32xf32>
    %11 = arith.mulf %9, %10 : vector<16x32xf32>
    %12 = math.roundeven %11 : vector<16x32xf32>
    %cst_8 = arith.constant 0.0666666701 : f32
    %13 = vector.broadcast %cst_8 : f32 to vector<16x32xf32>
    %14 = arith.mulf %12, %13 : vector<16x32xf32>
    %15 = arith.truncf %14 : vector<16x32xf32> to vector<16x32xbf16>
    %c0_9 = arith.constant 0 : index
    %c0_10 = arith.constant 0 : index
    %16 = vector.load %arg5[%c0_9, %c0_10] : memref<16x32xbf16, #tpu.memory_space<vmem>>, vector<16x32xbf16>
    tpu.vector_store %arg5[%c0_9, %c0_10], %15 {strides = array<i32>} : memref<16x32xbf16, #tpu.memory_space<vmem>>, vector<16x32xbf16>,
    return
  }
  func.func @transform_0(%arg0: i32, %arg1: i32) -> (i32, i32) {
    %c0_i32 = arith.constant 0 : i32
    %c0_i32_0 = arith.constant 0 : i32
    return %arg0, %c0_i32 : i32, i32
  }
  func.func @transform_1(%arg0: i32, %arg1: i32) -> (i32, i32) {
    %c0_i32 = arith.constant 0 : i32
    %c0_i32_0 = arith.constant 0 : i32
    return %c0_i32, %arg1 : i32, i32
  }
  func.func @transform_2(%arg0: i32, %arg1: i32) -> (i32, i32) {
    %c0_i32 = arith.constant 0 : i32
    %c0_i32_0 = arith.constant 0 : i32
    return %c0_i32, %arg1 : i32, i32
  }
  func.func @transform_3(%arg0: i32, %arg1: i32) -> (i32, i32) {
    %c0_i32 = arith.constant 0 : i32
    return %arg0, %arg1 : i32, i32
  }
}

</mosaic_0001>

<bundles_post_ra>
// kernel: quantized_patch_embed.1
= control target key start
LH: loop header
LB: loop body
LE: loop exit
PB: predicated region body
PF: predicated region fallthrough
CT: control target
= control target key end

     0   :  { %8 = vsyncpa [#allocation3], 0  ;;  %s741_s0 = inlined_call_operand.vmem [shape: bf16[32,64], index: 0, kind: input, shape index: {}]   ;;  %s742_s1 = inlined_call_operand.vmem [shape: bf16[64,32], index: 1, kind: input, shape index: {}]   ;;  %s743_s2 = inlined_call_operand.vmem [shape: f32[1,32], index: 2, kind: input, shape index: {}]   ;;  %s744_s3 = inlined_call_operand.hbm [shape: bf16[32,32], index: 3, kind: output, shape index: {}]  }
   0x1   :  { %10 = vsyncpa [#allocation3 + $0x1], 0  ;;  %s628_s12 = smov 0   ;;  %s630_s13 = smov 0  }
   0x2   :  { %s632_s14 = smov 0   ;;  %s634_s15 = smov 0  }
   0x3   :  { %s636_s16 = smov 0   ;;  %s638_s17 = smov 0  }
   0x4 LB: > { %s410_s18 = sadd.s32 4294967295, %s604_s17   ;;  %s411_s19 = sadd.s32 4294967294, %s604_s17   ;;  %s604_s17 = sphi %s638_s17, %s16_s17   ;;  %s600_s16 = sphi %s636_s16, %s751_s16   ;;  %s596_s15 = sphi %s634_s15, %s750_s15   ;;  %s592_s14 = sphi %s632_s14, %s749_s14   ;;  %s588_s13 = sphi %s630_s13, %s748_s13   ;;  %s584_s12 = sphi %s628_s12, %s747_s12  }
   0x5   : > { %s28_s20 = sadd.s32 1, %s600_s16  ;;  %s115_s21 = sadd.s32 1, %s592_s14 }
   0x6   : > { %p30_p0 = scmp.ge.s32.totalorder %s28_s20, 2  ;;  %p125_p1 = scmp.ne.s32.totalorder %s592_s14, %s588_s13 }
   0x7   : > { %p126_p2 = scmp.eq.s32.totalorder %s410_s18, 1  ;;  %p131_p3 = scmp.ne.s32.totalorder %s588_s13, %s584_s12 }
   0x8   : > { %s753_s20 = smov (%p30_p0, %s28_s20), 0  ;;  %p132_p5 = scmp.eq.s32.totalorder %s411_s19, 1 }
   0x9   : > { %p668_p4 = por %p126_p2, %p125_p1  ;;  %s110_s23 = ssub.s32 %s600_s16, %s753_s20 }
   0xa   : > { %p416_p6 = scmp.ge.s32.totalorder %s604_s17, 1  ;;  %p113_p7 = scmp.eq.s32.totalorder %s110_s23, 0 }
   0xb   : > { %p675_p8 = por %p132_p5, %p131_p3  ;;  %p172_p9 = scmp.lt.s32.totalorder %s604_s17, 3 }
   0xc   : > { %s681_s25 = scalar_select %p113_p7, %s592_s14, %s115_s21  }
   0xd   : > { %p173_p10 = pnand %p416_p6, %p172_p9 }
   0xe   : > { %s418_s28 = sshll.u32 (!%p173_p10), %s596_s15, 1  ;;  %s200_s21 = sand.u32 (!%p173_p10), 1, %s588_s13  }
   0xf   : > { %176 = sbr.rel (%p173_p10) target bundleno = 195 (0xc3), region = 32  ;;  %p204_p11 = scmp.lt.s32.totalorder (!%p173_p10), %s418_s28, 3 }
  0x10   : > { %s417_s23 = sshll.u32 (!%p173_p10), %s200_s21, 3  ;;  %s451_s26 = sshll.u32 (!%p173_p10), %s596_s15, 3 }
  0x11   : > { %s307_s29 = scalar_lea.hbm (!%p173_p10), %s744_s3, %s451_s26  ;;  %s202_s30 = scalar_lea.vmem (!%p173_p10), [#allocation2], %s417_s23 }
  0x12   : > { %s308_s4 = sshll.u32 (!%p173_p10), %s202_s30, 4  ;;  %s310_s5 = sshll.u32 (!%p173_p10), %s307_s29, 4  ;;  %s309_s4 = int_to_ptr.vmem [resolvable:$true] %s308_s4  ;;  %s311_s5 = int_to_ptr.hbm [resolvable:$true] %s310_s5 }
  0x13   : > { %s295_s15 = scalar_lea.sflag (!%p173_p10), [#allocation3], %s200_s21  ;;  %s546_s10 = scalar_lea.hbm (!%p173_p10), %s744_s3, 16 }
  0x14   : > { %v450_v0 = vld [vmem:[%s742_s1 + $0x18] sm:$0xff]  ;;  %v449_v1 = vld [vmem:[%s742_s1 + $0x10] sm:$0xff]  ;;  %s755_s28 = smov (!%p204_p11, %s418_s28), 3  ;;  %v448_v2 = vld [vmem:[%s742_s1 + $0x8] sm:$0xff]  ;;  %vm261_vm0 = vcmask 523264   ;;  %vm291_vm2 = vcmask 257024  }
  0x15   : > { %269 = vmatpush.bf16.msra.mxu0 %v450_v0  ;;  %s419_s6 = sshll.u32 %s755_s28, 2  ;;  %v447_v3 = vld [vmem:[%s742_s1] sm:$0xff] }
  0x16   : > { %s207_s11 = scalar_lea.vmem %s741_s0, %s419_s6  ;;  %v525_v5 = vld [vmem:[%s743_s2] ss:$0 sm:$0xff]  ;;  %s540_s6 = sshra.s32 %s311_s5, 4  ;;  %s541_s6 = int_to_ptr.hbm [resolvable:$true] %s540_s6 }
  0x17   : > { %v446_v4 = vld [vmem:[%s207_s11] sm:$0xff]  ;;  %s542_s7 = scalar_lea.hbm %s541_s6, 8  ;;  %p547_p1 = scmp.lt.s32.totalorder %s541_s6, %s744_s3 }
  0x18   : > { %p543_p12 = scmp.ne.s32.totalorder %s541_s6, %s542_s7  ;;  %p548_p2 = scmp.lt.s32.totalorder %s546_s10, %s542_s7 }
  0x19   : > { %270 = vmatpush.bf16.msra.mxu0 %v449_v1 }
  0x1a   : > { %p544_p13 = pnand %p543_p12, %p668_p4  ;;  %p549_p3 = por %p548_p2, %p547_p1 }
  0x1c   : > { %p545_p0 = pneg %p544_p13 }
  0x1d   : > { %271 = vmatpush.bf16.msra.mxu0 %v448_v2 }
  0x1e   : > { %p550_p5 = pnand %p549_p3, %p545_p0 }
  0x21   : > { %272 = vmatpush.bf16.msra.mxu0 %v447_v3 }
  0x24   : > { %440 = vmatmul.msk.bf16.vlgmr.msra.gmra.mxu0 %vm261_vm0, %v446_v4 }
  0xa1   : > { %v274_v6 = vpop.f32.mrf.mxu0 }
  0xa2   : > { %v275_v7 = vadd.f32 %v525_v5, %v274_v6 }
  0xa4   : > { %v279_v8 = vmax.f32 %v275_v7, 0.0 }
  0xa6   : > { %v281_v9 = vmin.f32 %v279_v8, 1.0 }
  0xa8   : > { %v283_v10 = vmul.f32 15.0, %v281_v9 }
  0xa9   : > { %v276_v11 = vpop.f32.mrf.mxu0 }
  0xaa   : > { %v454_v12 = vcvt.f32.s32 %v283_v10  ;;  %v277_v13 = vadd.f32 %v525_v5, %v276_v11  ;;  %v452_v16 = vand.u32 2147483647, %v283_v10  ;;  %v457_v18 = vand.u32 2147483648, %v283_v10 }
  0xac   : > { %v455_v14 = vcvt.s32.f32 %v454_v12  ;;  %v280_v15 = vmax.f32 %v277_v13, 0.0  ;;  %vm453_vm1 = vcmp.lt.f32.partialorder %v452_v16, 8388608.0 }
  0xae   : > { %v456_v17 = vand.u32 2147483647, %v455_v14  ;;  %v282_v19 = vmin.f32 %v280_v15, 1.0 }
  0xb0   : > { %v458_v20 = vor.u32 %v457_v18, %v456_v17  ;;  %v284_v21 = vmul.f32 15.0, %v282_v19 }
  0xb2   : > { %v459_v22 = vsel %vm453_vm1, %v458_v20, %v283_v10  ;;  %v462_v23 = vcvt.f32.s32 %v284_v21  ;;  %v460_v27 = vand.u32 2147483647, %v284_v21  ;;  %v465_v29 = vand.u32 2147483648, %v284_v21 }
  0xb3   : > { %v287_v24 = vmul.f32 0.06666667, %v459_v22 }
  0xb4   : > { %v463_v25 = vcvt.s32.f32 %v462_v23  ;;  %vm461_vm3 = vcmp.lt.f32.partialorder %v460_v27, 8388608.0 }
  0xb5   : > { %v289_v26 = vpack.c.bf16 %v287_v24, %v287_v24 }
  0xb6   : > { %v464_v28 = vand.u32 2147483647, %v463_v25 }
  0xb7   : > { %292 = vst.msk [vmem:[%s202_s30] sm:$0xf] %vm291_vm2, %v289_v26 }
  0xb8   : > { %v466_v30 = vor.u32 %v465_v29, %v464_v28 }
  0xba   : > { %v467_v31 = vsel %vm461_vm3, %v466_v30, %v284_v21 }
  0xbb   : > { %v288_v32 = vmul.f32 0.06666667, %v467_v31 }
  0xbd   : > { %v290_v33 = vpack.c.bf16 %v288_v32, %v288_v32 }
  0xbf   : > { %293 = vst.msk [vmem:[%s202_s30 + $0x4] sm:$0xf] %vm291_vm2, %v290_v33 }
  0xc0   : > { %553 = shalt.err (!%p550_p5)
}
  0xc1   : > { %s606_s19 = smov 64   ;;  %s607_s21 = smov 4  }
  0xc2   : > { %468 = dma.vmem_to_hbm [thread:$0]  (%p668_p4), %s309_s4, 128, %s311_s5, %s295_s15, %s606_s19, %s606_s19, %s607_s21  }
  0xc3 PF: > { %p474_p6 = scmp.ge.s32.totalorder %s604_s17, 2  ;;  %s325_s23 = sand.u32 1, %s584_s12  }
  0xc4   : > { %s326_s26 = scalar_lea.sflag [#allocation3], %s325_s23 }
  0xc5   : > { %p471_p7 = pnand %p474_p6, %p675_p8 }
  0xc7   : > { %p472_p9 = pneg %p471_p7 }
  0xc9   : > { %579 = dma.done.wait (%p472_p9), %s326_s26, 128  }
  0xca   : > { %581 = vsyncadd (%p472_p9), %s326_s26, 4294967168  ;;  %s16_s17 = sadd.s32 1, %s604_s17   ;;  %s747_s12 = smov %s588_s13 }
  0xcb   : > { %p13_p10 = scmp.ge.s32.totalorder %s16_s17, 4   ;;  %s748_s13 = smov %s592_s14 }
  0xcc   : > { %s749_s14 = smov %s681_s25  ;;  %s750_s15 = smov %s600_s16 }
  0xcd   : > { %s751_s16 = smov %s753_s20  ;;  %15 = sbr.rel (!%p13_p10) target bundleno = 4 (0x4), region = 73 }
  0xd2   :  { %332 = vsyncpa [#allocation3], 1 }
  0xd3   :  { %334 = vsyncpa [#allocation3 + $0x1], 1 }

</bundles_post_ra>
